<compile_context>
chip_gen: v5e
topology: v5e:2x2
jax: 0.10.0
libtpu: 0.0.40
codegen_flags: <defaults>
</compile_context>

<pallas_src>
import functools

import jax
import jax.numpy as jnp
from jax import lax
from jax.experimental import pallas as pl
from jax.experimental.pallas import tpu as pltpu

EPS = 1e-8
_LANE = 128
_TILE_ALIGN = 512          # batch-tile granularity (multiple of 8 sublanes)
_MAX_TILE_ROWS = 32768     # bound per-step latency / last-tile waste


def _round_up(x, m):
    return ((x + m - 1) // m) * m


def _vmem_capacity_bytes():
    try:
        info = pltpu.get_tpu_info()
        cap = getattr(info, "vmem_capacity_bytes", None)
        if cap:
            return int(cap)
    except Exception:
        pass
    return 64 * 1024 * 1024  # conservative (v7x-sized) fallback


def _scan_loss_kernel(a_ref, p_ref, logsim_ref, aprob_ref, *, valid_last):
    """One batch tile [tile_rows, num_classes] -> per-tile partial sums."""
    tb, n = a_ref.shape

    def compute_and_store(row_limit):
        a = a_ref[...].astype(jnp.float32)
        p = p_ref[...].astype(jnp.float32)

        if row_limit is not None:
            # Ragged final tile: neutralize out-of-bounds rows *before* any
            # math (pad contents are unspecified and could be inf/nan).
            row = lax.broadcasted_iota(jnp.int32, (tb, 1), 0)
            valid = row < row_limit
            a = jnp.where(valid, a, 0.0)
            p = jnp.where(valid, p, 0.0)

        # Anchor softmax over classes (lane axis); reciprocal + multiply.
        a_max = jnp.max(a, axis=-1, keepdims=True)
        a_exp = jnp.exp(a - a_max)
        a_prob = a_exp * pl.reciprocal(jnp.sum(a_exp, axis=-1, keepdims=True))

        # Neighbor softmax: skip full normalization, fold 1/sum into the dot.
        p_max = jnp.max(p, axis=-1, keepdims=True)
        p_exp = jnp.exp(p - p_max)
        p_inv = pl.reciprocal(jnp.sum(p_exp, axis=-1, keepdims=True))

        # Per-sample dot product <anchors_prob, neighbors_prob> -> [tb, 1]
        sim = jnp.sum(a_prob * p_exp, axis=-1, keepdims=True) * p_inv

        # BCE(sim, 1) = -log(sim); log clamped at -100 (torch BCELoss).
        log_sim = jnp.maximum(jnp.log(sim), -100.0)

        if row_limit is not None:
            log_sim = jnp.where(valid, log_sim, 0.0)
            a_prob = jnp.where(valid, a_prob, 0.0)

        logsim_ref[...] = jnp.sum(log_sim, axis=0, keepdims=True).reshape(1, 1, 1)
        aprob_ref[...] = jnp.sum(a_prob, axis=0, keepdims=True).reshape(1, 1, n)

    if valid_last == tb:
        # Every tile is full -> no masking anywhere (common path).
        compute_and_store(None)
    else:
        i = pl.program_id(0)
        last = pl.num_programs(0) - 1

        @pl.when(i < last)
        def _full_tile():
            compute_and_store(None)

        @pl.when(i == last)
        def _ragged_tile():
            compute_and_store(valid_last)


def scan_loss(anchors, neighbors, entropy_weight=2.0, *, max_tile_rows=None):
    """Pallas implementation of SCANLoss.forward.

    anchors, neighbors: [b, num_classes] logits (f32 or bf16).
    Returns (total_loss, consistency_loss, entropy_loss) as float32 scalars.
    `max_tile_rows` optionally caps the batch tile (testing / tuning).
    """
    b, n = anchors.shape
    assert neighbors.shape == (b, n)

    n_lanes = _round_up(n, _LANE)              # lane padding in VMEM
    itemsize = jnp.dtype(anchors.dtype).itemsize

    # Batch-tile sizing from the VMEM budget: 2 inputs x 2 pipeline buffers,
    # each lane-padded block = tile_rows * n_lanes * itemsize bytes.
    vmem_cap = _vmem_capacity_bytes()
    budget = min(int(0.45 * vmem_cap), 96 * 1024 * 1024)
    cap_rows = budget // (4 * n_lanes * itemsize)
    cap_rows = max(_TILE_ALIGN, (cap_rows // _TILE_ALIGN) * _TILE_ALIGN)
    cap_rows = min(cap_rows, _MAX_TILE_ROWS)
    if max_tile_rows is not None:
        cap_rows = min(cap_rows, max(8, (int(max_tile_rows) // 8) * 8))

    if b <= cap_rows:
        tile_rows = b                          # single block = whole batch
        grid_rows = 1
        valid_last = b
    else:
        tile_rows = cap_rows                   # multiple of 8 (sublane rule)
        grid_rows = -(-b // tile_rows)         # ceil-div; ragged last tile OK
        valid_last = b - (grid_rows - 1) * tile_rows

    needed = 4 * tile_rows * n_lanes * itemsize
    vmem_limit = int(min(0.9 * vmem_cap, needed + (16 << 20)))
    vmem_limit = max(vmem_limit, 32 << 20)

    kernel = functools.partial(_scan_loss_kernel, valid_last=valid_last)

    logsim_part, aprob_part = pl.pallas_call(
        kernel,
        grid=(grid_rows,),
        in_specs=[
            pl.BlockSpec((tile_rows, n), lambda i: (i, 0)),   # anchors
            pl.BlockSpec((tile_rows, n), lambda i: (i, 0)),   # neighbors
        ],
        out_specs=(
            pl.BlockSpec((1, 1, 1), lambda i: (i, 0, 0)),     # sum log(sim)
            pl.BlockSpec((1, 1, n), lambda i: (i, 0, 0)),     # sum anchor prob
        ),
        out_shape=(
            jax.ShapeDtypeStruct((grid_rows, 1, 1), jnp.float32),
            jax.ShapeDtypeStruct((grid_rows, 1, n), jnp.float32),
        ),
        compiler_params=pltpu.CompilerParams(
            dimension_semantics=("parallel",),   # independent tiles -> 2 TCs on v7x
            vmem_limit_bytes=vmem_limit,
        ),
    )(anchors, neighbors)

    # Tiny O(grid * n) epilogue in plain JAX.
    inv_b = 1.0 / b
    consistency = -jnp.sum(logsim_part) * inv_b           # mean BCE(sim, 1)
    mean_prob = jnp.sum(aprob_part, axis=(0, 1)) * inv_b  # [n]
    x_ = jnp.maximum(mean_prob, EPS)
    entropy = -jnp.sum(x_ * jnp.log(x_))
    total = consistency - entropy_weight * entropy
    return total, consistency, entropy


def _reference_scan_loss(anchors, neighbors, entropy_weight=2.0):
    """Pure-JAX reference mirroring the PyTorch module (sanity check)."""
    a_prob = jax.nn.softmax(anchors.astype(jnp.float32), axis=-1)
    p_prob = jax.nn.softmax(neighbors.astype(jnp.float32), axis=-1)
    sim = jnp.sum(a_prob * p_prob, axis=-1)
    consistency = -jnp.mean(jnp.maximum(jnp.log(sim), -100.0))
    mean_prob = jnp.mean(a_prob, axis=0)
    x_ = jnp.maximum(mean_prob, EPS)
    ent = -jnp.sum(x_ * jnp.log(x_))
    total = consistency - entropy_weight * ent
    return total, consistency, ent


if __name__ == "__main__":
    key = jax.random.PRNGKey(0)

    # Small shapes consistent with the module ([batch, num_classes] logits).
    # Third case caps the tile to exercise multi-tile + ragged-tile masking
    # and the cross-tile partial-sum reduction.
    cases = [
        dict(b=8, n=16, max_tile_rows=None),
        dict(b=600, n=10, max_tile_rows=None),
        dict(b=1200, n=10, max_tile_rows=512),
    ]
    for c in cases:
        key, k1, k2 = jax.random.split(key, 3)
        anchors = jax.random.normal(k1, (c["b"], c["n"]), dtype=jnp.float32)
        neighbors = jax.random.normal(k2, (c["b"], c["n"]), dtype=jnp.float32)

        total, cons, ent = scan_loss(anchors, neighbors, entropy_weight=2.0,
                                     max_tile_rows=c["max_tile_rows"])
        jax.block_until_ready((total, cons, ent))

        rt, rc, re = _reference_scan_loss(anchors, neighbors, 2.0)
        assert jnp.allclose(total, rt, rtol=1e-5, atol=1e-5), (c, total, rt)
        assert jnp.allclose(cons, rc, rtol=1e-5, atol=1e-5), (c, cons, rc)
        assert jnp.allclose(ent, re, rtol=1e-5, atol=1e-5), (c, ent, re)

    print("KERNEL_OK")
</pallas_src>

<mosaic_0001>
module attributes {stable_mosaic.version = 11 : i64} {
  func.func @_scan_loss_kernel(%arg0: i32, %arg1: memref<8x16xf32, #tpu.memory_space<vmem>>, %arg2: memref<8x16xf32, #tpu.memory_space<vmem>>, %arg3: memref<1x1x1xf32, #tpu.memory_space<vmem>>, %arg4: memref<1x1x16xf32, #tpu.memory_space<vmem>>) attributes {dimension_semantics = [#tpu.dimension_semantics<parallel>], iteration_bounds = array<i64: 1>, scalar_prefetch = 0 : i64, scratch_operands = 0 : i64, tpu.core_type = #tpu.core_type<tc>, window_params = [{transform_indices = @transform_0, window_bounds = array<i64: 8, 16>}, {transform_indices = @transform_1, window_bounds = array<i64: 8, 16>}, {transform_indices = @transform_2, window_bounds = array<i64: 1, 1, 1>}, {transform_indices = @transform_3, window_bounds = array<i64: 1, 1, 16>}]} {
    %c0 = arith.constant 0 : index
    %c0_0 = arith.constant 0 : index
    %0 = vector.load %arg1[%c0, %c0_0] : memref<8x16xf32, #tpu.memory_space<vmem>>, vector<8x16xf32>
    %c0_1 = arith.constant 0 : index
    %c0_2 = arith.constant 0 : index
    %1 = vector.load %arg2[%c0_1, %c0_2] : memref<8x16xf32, #tpu.memory_space<vmem>>, vector<8x16xf32>
    %cst = arith.constant dense<0xFF800000> : vector<8xf32>
    %2 = vector.multi_reduction <maximumf>, %0, %cst [1] : vector<8x16xf32> to vector<8xf32>
    %3 = vector.shape_cast %2 : vector<8xf32> to vector<8x1xf32>
    %4 = vector.broadcast %3 : vector<8x1xf32> to vector<8x16xf32>
    %5 = arith.subf %0, %4 : vector<8x16xf32>
    %6 = math.exp %5 : vector<8x16xf32>
    %cst_3 = arith.constant dense<0.000000e+00> : vector<8xf32>
    %7 = vector.multi_reduction <add>, %6, %cst_3 [1] : vector<8x16xf32> to vector<8xf32>
    %8 = vector.shape_cast %7 : vector<8xf32> to vector<8x1xf32>
    %9 = tpu.reciprocal %8 : vector<8x1xf32> -> vector<8x1xf32>
    %10 = vector.broadcast %9 : vector<8x1xf32> to vector<8x16xf32>
    %11 = arith.mulf %6, %10 : vector<8x16xf32>
    %cst_4 = arith.constant dense<0xFF800000> : vector<8xf32>
    %12 = vector.multi_reduction <maximumf>, %1, %cst_4 [1] : vector<8x16xf32> to vector<8xf32>
    %13 = vector.shape_cast %12 : vector<8xf32> to vector<8x1xf32>
    %14 = vector.broadcast %13 : vector<8x1xf32> to vector<8x16xf32>
    %15 = arith.subf %1, %14 : vector<8x16xf32>
    %16 = math.exp %15 : vector<8x16xf32>
    %cst_5 = arith.constant dense<0.000000e+00> : vector<8xf32>
    %17 = vector.multi_reduction <add>, %16, %cst_5 [1] : vector<8x16xf32> to vector<8xf32>
    %18 = vector.shape_cast %17 : vector<8xf32> to vector<8x1xf32>
    %19 = tpu.reciprocal %18 : vector<8x1xf32> -> vector<8x1xf32>
    %20 = arith.mulf %11, %16 : vector<8x16xf32>
    %cst_6 = arith.constant dense<0.000000e+00> : vector<8xf32>
    %21 = vector.multi_reduction <add>, %20, %cst_6 [1] : vector<8x16xf32> to vector<8xf32>
    %22 = vector.shape_cast %21 : vector<8xf32> to vector<8x1xf32>
    %23 = arith.mulf %22, %19 : vector<8x1xf32>
    %24 = math.log %23 : vector<8x1xf32>
    %cst_7 = arith.constant -1.000000e+02 : f32
    %25 = vector.broadcast %cst_7 : f32 to vector<8x1xf32>
    %26 = arith.maximumf %24, %25 : vector<8x1xf32>
    %cst_8 = arith.constant dense<0.000000e+00> : vector<1xf32>
    %27 = vector.multi_reduction <add>, %26, %cst_8 [0] : vector<8x1xf32> to vector<1xf32>
    %28 = vector.shape_cast %27 : vector<1xf32> to vector<1x1xf32>
    %29 = vector.shape_cast %28 : vector<1x1xf32> to vector<1x1x1xf32>
    %c0_9 = arith.constant 0 : index
    %c0_10 = arith.constant 0 : index
    %c0_11 = arith.constant 0 : index
    %30 = vector.load %arg3[%c0_9, %c0_10, %c0_11] : memref<1x1x1xf32, #tpu.memory_space<vmem>>, vector<1x1x1xf32>
    tpu.vector_store %arg3[%c0_9, %c0_10, %c0_11], %29 {strides = array<i32>} : memref<1x1x1xf32, #tpu.memory_space<vmem>>, vector<1x1x1xf32>,
    %cst_12 = arith.constant dense<0.000000e+00> : vector<16xf32>
    %31 = vector.multi_reduction <add>, %11, %cst_12 [0] : vector<8x16xf32> to vector<16xf32>
    %32 = vector.shape_cast %31 : vector<16xf32> to vector<1x16xf32>
    %33 = vector.shape_cast %32 : vector<1x16xf32> to vector<1x1x16xf32>
    %c0_13 = arith.constant 0 : index
    %c0_14 = arith.constant 0 : index
    %c0_15 = arith.constant 0 : index
    %34 = vector.load %arg4[%c0_13, %c0_14, %c0_15] : memref<1x1x16xf32, #tpu.memory_space<vmem>>, vector<1x1x16xf32>
    tpu.vector_store %arg4[%c0_13, %c0_14, %c0_15], %33 {strides = array<i32>} : memref<1x1x16xf32, #tpu.memory_space<vmem>>, vector<1x1x16xf32>,
    return
  }
  func.func @transform_0(%arg0: i32) -> (i32, i32) {
    %c0_i32 = arith.constant 0 : i32
    %c0_i32_0 = arith.constant 0 : i32
    return %arg0, %c0_i32 : i32, i32
  }
  func.func @transform_1(%arg0: i32) -> (i32, i32) {
    %c0_i32 = arith.constant 0 : i32
    %c0_i32_0 = arith.constant 0 : i32
    return %arg0, %c0_i32 : i32, i32
  }
  func.func @transform_2(%arg0: i32) -> (i32, i32, i32) {
    %c0_i32 = arith.constant 0 : i32
    %c0_i32_0 = arith.constant 0 : i32
    %c0_i32_1 = arith.constant 0 : i32
    return %arg0, %c0_i32, %c0_i32_0 : i32, i32, i32
  }
  func.func @transform_3(%arg0: i32) -> (i32, i32, i32) {
    %c0_i32 = arith.constant 0 : i32
    %c0_i32_0 = arith.constant 0 : i32
    %c0_i32_1 = arith.constant 0 : i32
    return %arg0, %c0_i32, %c0_i32_0 : i32, i32, i32
  }
}

</mosaic_0001>

<bundles_post_ra>
// kernel: tpu_custom_call.1
= control target key start
LH: loop header
LB: loop body
LE: loop exit
PB: predicated region body
PF: predicated region fallthrough
CT: control target
= control target key end

     0   :  { %9 = vsyncpa [#allocation3], 0  ;;  %s312_s0 = inlined_call_operand.hbm [shape: f32[8,16], index: 0, kind: input, shape index: {}]   ;;  %s313_s1 = inlined_call_operand.hbm [shape: f32[8,16], index: 1, kind: input, shape index: {}]   ;;  %s314_s2 = inlined_call_operand.hbm [shape: f32[1,1,1], index: 2, kind: output, shape index: {0}]   ;;  %s315_s3 = inlined_call_operand.hbm [shape: f32[1,1,16], index: 3, kind: output, shape index: {1}]  }
   0x1   :  { %10 = vsyncpa [#allocation6], 0 }
   0x2   :  { %11 = vsyncpa [#allocation4], 0 }
   0x3   :  { %12 = vsyncpa [#allocation9], 0  ;;  %s18_s14 = sshll.u32 %s312_s0, 4  ;;  %s270_s15 = smov [#allocation2]   ;;  %s19_s14 = int_to_ptr.hbm [resolvable:$true] %s18_s14 }
   0x4   :  { %s20_s16 = sshll.u32 %s270_s15, 4  ;;  %s29_s19 = sshll.u32 %s313_s1, 4  ;;  %s21_s16 = int_to_ptr.vmem [resolvable:$true] %s20_s16  ;;  %s30_s19 = int_to_ptr.hbm [resolvable:$true] %s29_s19 }
   0x5   :  { %23 = dma.hbm_to_vmem [thread:$0]  %s19_s14, 128, %s21_s16, [#allocation3]  }
   0x6   :  { %s271_s20 = smov [#allocation5]  }
   0x7   :  { %s31_s21 = sshll.u32 %s271_s20, 4  ;;  %s32_s21 = int_to_ptr.vmem [resolvable:$true] %s31_s21 }
   0x8   :  { %34 = dma.hbm_to_vmem [thread:$0]  %s30_s19, 128, %s32_s21, [#allocation6]  }
   0x9   :  { %262 = dma.done.wait [#allocation3], 128  }
   0xa   :  { %263 = vsyncadd [#allocation3], 4294967168 }
   0xb   :  { %264 = dma.done.wait [#allocation6], 128  }
   0xc   :  { %265 = vsyncadd [#allocation6], 4294967168  ;;  %vm45_vm0 = vcmask 130048   ;;  %v43_v0 = vld [vmem:[#allocation2] sm:$0xff]  ;;  %v44_v2 = vld [vmem:[#allocation5] sm:$0xff]  ;;  %vm116_vm5 = vcmask 122880  }
   0xd   :  { %v46_v1 = vsel %vm45_vm0, %v43_v0, -inf  ;;  %v70_v3 = vsel %vm45_vm0, %v44_v2, -inf  ;;  %s272_s0 = smov [#allocation8]   ;;  %s136_s24 = sshll.u32 %s315_s3, 4  ;;  %vm107_vm10 = vcmask 0   ;;  %s137_s24 = int_to_ptr.hbm [resolvable:$true] %s136_s24 }
   0xe   :  { %47 = vmax.xlane.f32.xlu0 %v46_v1  ;;  %s134_s1 = sshll.u32 %s272_s0, 4  ;;  %s273_s3 = smov [#allocation7]   ;;  %s135_s1 = int_to_ptr.vmem [resolvable:$true] %s134_s1 }
   0xf   :  { %s123_s25 = sshll.u32 %s273_s3, 4  ;;  %s125_s28 = sshll.u32 %s314_s2, 4  ;;  %s124_s25 = int_to_ptr.vmem [resolvable:$true] %s123_s25  ;;  %s126_s28 = int_to_ptr.hbm [resolvable:$true] %s125_s28 }
  0x16   :  { %71 = vmax.xlane.f32.xlu0 %v70_v3 }
  0x81   :  { %v48_v4 = vpop.xlane.xlu0 %47 }
  0x82   :  { %v49_v5 = vsub.f32 %v43_v0, %v48_v4 }
  0x84   :  { %v50_v6 = vmul.f32 1.442695, %v49_v5 }
  0x86   :  { %156 = vpow2.f32 %v50_v6 }
  0x89   :  { %v72_v7 = vpop.xlane.xlu0 %71 }
  0x8a   :  { %v73_v8 = vsub.f32 %v44_v2, %v72_v7 }
  0x8c   :  { %v157_v9 = vpop.eup %156  ;;  %v74_v10 = vmul.f32 1.442695, %v73_v8 }
  0x8d   :  { %v52_v11 = vsel %vm45_vm0, %v157_v9, 0.0 }
  0x8e   :  { %53 = vadd.xlane.f32.xlu1 %v52_v11  ;;  %158 = vpow2.f32 %v74_v10 }
  0x94   :  { %v159_v12 = vpop.eup %158 }
  0x95   :  { %v76_v13 = vsel %vm45_vm0, %v159_v12, 0.0 }
  0x96   :  { %77 = vadd.xlane.f32.xlu1 %v76_v13 }
 0x101   :  { %v54_v14 = vpop.xlane.xlu1 %53 }
 0x102   :  { %160 = vrcp.f32 %v54_v14  ;;  %v66_v18 = vand.u32 2147483648, %v54_v14  ;;  %v64_v20 = vand.u32 2147483647, %v54_v14  ;;  %vm60_vm2 = vweird.f32 %v54_v14 }
 0x104   :  { %v67_v22 = vor.u32 1.1754944e-38, %v66_v18  ;;  %vm65_vm4 = vcmp.eq.f32.partialorder %v64_v20, 8.507059e+37 }
 0x108   :  { %v161_v15 = vpop.eup %160 }
 0x109   :  { %v56_v16 = vmul.f32 %v161_v15, %v54_v14  ;;  %vm61_vm1 = vweird.f32 %v161_v15  ;;  %v78_v35 = vpop.xlane.xlu1 %77 }
 0x10a   :  { %vm62_vm3 = vmor %vm60_vm2, %vm61_vm1  ;;  %162 = vrcp.f32 %v78_v35  ;;  %vm84_vm6 = vweird.f32 %v78_v35  ;;  %v90_v40 = vand.u32 2147483648, %v78_v35  ;;  %v88_v42 = vand.u32 2147483647, %v78_v35 }
 0x10b   :  { %v57_v17 = vsub.f32 1.0, %v56_v16 }
 0x10c   :  { %v91_v43 = vor.u32 1.1754944e-38, %v90_v40  ;;  %vm89_vm9 = vcmp.eq.f32.partialorder %v88_v42, 8.507059e+37 }
 0x10d   :  { %v58_v19 = vmul.f32 %v161_v15, %v57_v17 }
 0x10f   :  { %v59_v21 = vadd.f32 %v161_v15, %v58_v19 }
 0x110   :  { %v163_v36 = vpop.eup %162 }
 0x111   :  { %v63_v23 = vsel %vm62_vm3, %v161_v15, %v59_v21  ;;  %v80_v37 = vmul.f32 %v163_v36, %v78_v35  ;;  %vm85_vm7 = vweird.f32 %v163_v36 }
 0x112   :  { %v68_v24 = vsel %vm65_vm4, %v67_v22, %v63_v23  ;;  %vm86_vm8 = vmor %vm84_vm6, %vm85_vm7 }
 0x113   :  { %v69_v25 = vmul.f32 %v157_v9, %v68_v24  ;;  %v81_v38 = vsub.f32 1.0, %v80_v37 }
 0x115   :  { %v93_v26 = vmul.f32 %v159_v12, %v69_v25  ;;  %v109_v27 = vsel %vm45_vm0, %v69_v25, 0.0  ;;  %v82_v39 = vmul.f32 %v163_v36, %v81_v38 }
 0x116   :  { %v110_v28 = vrot.slane %v109_v27, 4 }
 0x117   :  { %v94_v29 = vsel %vm45_vm0, %v93_v26, 0.0  ;;  %v83_v41 = vadd.f32 %v163_v36, %v82_v39 }
 0x118   :  { %v111_v30 = vadd.f32 %v110_v28, %v109_v27  ;;  %95 = vadd.xlane.f32.xlu2 %v94_v29 }
 0x119   :  { %v87_v44 = vsel %vm86_vm8, %v163_v36, %v83_v41 }
 0x11a   :  { %v112_v31 = vrot.slane %v111_v30, 2  ;;  %v92_v46 = vsel %vm89_vm9, %v91_v43, %v87_v44 }
 0x11c   :  { %v113_v32 = vadd.f32 %v112_v31, %v111_v30 }
 0x11e   :  { %v114_v33 = vrot.slane %v113_v32, 1 }
 0x120   :  { %v115_v34 = vadd.f32 %v114_v33, %v113_v32 }
 0x122   :  { %117 = vst.msk [vmem:[#allocation8] sm:$0x1] %vm116_vm5, %v115_v34 }
 0x123   :  { %139 = dma.vmem_to_hbm [thread:$0]  %s135_s1, 16, %s137_s24, [#allocation9]  }
 0x18b   :  { %v96_v45 = vpop.xlane.xlu2 %95 }
 0x18c   :  { %v97_v47 = vmul.f32 %v96_v45, %v92_v46 }
 0x18e   :  { %164 = vlog2.f32 %v97_v47 }
 0x194   :  { %v165_v48 = vpop.eup %164 }
 0x195   :  { %v99_v49 = vmul.f32 0.6931472, %v165_v48 }
 0x197   :  { %v100_v50 = vmax.f32 %v99_v49, -100.0 }
 0x199   :  { %v101_v51 = vrot.slane %v100_v50, 4 }
 0x19b   :  { %v102_v52 = vadd.f32 %v101_v51, %v100_v50 }
 0x19d   :  { %v103_v53 = vrot.slane %v102_v52, 2 }
 0x19f   :  { %v104_v54 = vadd.f32 %v103_v53, %v102_v52 }
 0x1a1   :  { %v105_v55 = vrot.slane %v104_v54, 1 }
 0x1a3   :  { %v106_v56 = vadd.f32 %v105_v55, %v104_v54 }
 0x1a5   :  { %108 = vst.msk [vmem:[#allocation7] sm:$0x1] %vm107_vm10, %v106_v56 }
 0x1a6   :  { %128 = dma.vmem_to_hbm [thread:$0]  %s124_s25, 16, %s126_s28, [#allocation4]  }
 0x1a7   :  { %266 = dma.done.wait [#allocation4], 16  }
 0x1a8   :  { %267 = vsyncadd [#allocation4], 4294967280 }
 0x1a9   :  { %268 = dma.done.wait [#allocation9], 16  }
 0x1aa   :  { %269 = vsyncadd [#allocation9], 4294967280 }
 0x1ab   :  { %148 = vsyncpa [#allocation3], 1 }
 0x1ac   :  { %149 = vsyncpa [#allocation6], 1 }
 0x1ad   :  { %150 = vsyncpa [#allocation4], 1 }
 0x1ae   :  { %151 = vsyncpa [#allocation9], 1 }

</bundles_post_ra>
